<compile_context>
chip_gen: v7x
topology: tpu7x:2x2x1
jax: 0.10.0
libtpu: 0.0.40
codegen_flags: <defaults>
</compile_context>

<pallas_src>
import functools
import math

import numpy as np
import jax
import jax.numpy as jnp
from jax import lax
from jax.experimental import pallas as pl
from jax.experimental.pallas import tpu as pltpu

# -------- model constants (from NetConfig) --------
C_PLAQ_IN, C_RECT_IN = 2, 4
C_IN = C_PLAQ_IN + C_RECT_IN          # 6
C_HID = 14
C_PLAQ_OUT, C_RECT_OUT = 4, 8
C_OUT = C_PLAQ_OUT + C_RECT_OUT       # 12
C_MID = max(2, C_HID // 4)            # 3  (ChannelAttention bottleneck)
NUM_GROUPS = 2
EPS = 1e-5
KTAPS = 9                             # 3x3 kernel


# -------- in-kernel math helpers --------
def _erf(x):
    # TODO(synk): lax.erf has no Mosaic/TPU Pallas lowering; use the f32-accurate
    # Abramowitz-Stegun 7.1.26 rational approximation (max abs err ~1.5e-7).
    p = 0.3275911
    a1, a2, a3, a4, a5 = (0.254829592, -0.284496736, 1.421413741,
                          -1.453152027, 1.061405429)
    sgn = jnp.where(x < 0.0, -1.0, 1.0)
    ax = jnp.abs(x)
    t = 1.0 / (1.0 + p * ax)
    poly = ((((a5 * t + a4) * t + a3) * t + a2) * t + a1) * t
    return sgn * (1.0 - poly * jnp.exp(-ax * ax))


def _gelu(x):                          # exact (erf-based) GELU = F.gelu default
    return 0.5 * x * (1.0 + _erf(x * (1.0 / math.sqrt(2.0))))


def _silu(x):
    return x * jax.nn.sigmoid(x)


# -------- pltpu.roll shift-convention probe (cached, runs one tiny kernel) --------
_ROLL_SIGN = None


def _roll_sign():
    """Detect pltpu.roll's shift convention once, so the flattened circular-shift
    math is robust to the roll direction across JAX versions."""
    global _ROLL_SIGN
    if _ROLL_SIGN is None:
        def probe(x_ref, o_ref):
            o_ref[...] = pltpu.roll(x_ref[...], 1, 1)

        x = jnp.tile(jnp.arange(128, dtype=jnp.float32)[None, :], (8, 1))
        y = pl.pallas_call(
            probe, out_shape=jax.ShapeDtypeStruct((8, 128), jnp.float32))(x)
        v = float(y[0, 0])
        if v == 127.0:        # numpy-style: roll(x, s)[i] == x[(i - s) % n]
            _ROLL_SIGN = 1
        elif v == 1.0:        # opposite:    roll(x, s)[i] == x[(i + s) % n]
            _ROLL_SIGN = -1
        else:
            raise RuntimeError(f"unexpected pltpu.roll semantics (probe={v})")
    return _ROLL_SIGN


# -------- the fused Pallas kernel (one batch element per grid step) --------
def _localresattn_kernel(x_ref, wlo_ref, whi_ref, w_in_ref, w_rb_ref, vecs_ref,
                         ca_w1t_ref, ca_b1_ref, ca_w2_ref, w_out_ref, b_out_ref,
                         alphas_ref, o_ref, *, width, roll_sign):
    hw = x_ref.shape[-1]

    def vcol(i):                                   # (C_HID, 1) parameter column
        return vecs_ref[i]

    def shift_flat(v, s):
        # shift_flat(v, s)[:, i] == v[:, (i + s) % hw]   (s is a Python int)
        amt = (roll_sign * (-s)) % hw
        if amt == 0:
            return v
        return pltpu.roll(v, amt, axis=1)

    wlo = wlo_ref[...]                             # (1, hw): 1.0 where col == 0
    whi = whi_ref[...]                             # (1, hw): 1.0 where col == width-1

    def conv3x3(v, taps, bias_col):
        """Circular 'same' 3x3 conv on the flattened torus (channels-first)."""
        # column (dx) shifts: flat roll + arithmetic select fixing the row wrap
        m_main, m_alt = shift_flat(v, -1), shift_flat(v, width - 1)
        p_main, p_alt = shift_flat(v, 1), shift_flat(v, 1 - width)
        x_m1 = m_main + wlo * (m_alt - m_main)
        x_p1 = p_main + whi * (p_alt - p_main)
        variants = (x_m1, v, x_p1)                 # dx = -1, 0, +1
        co = taps[0].shape[0]
        acc = jnp.zeros((co, hw), jnp.float32)
        t = 0
        for dy in (-1, 0, 1):                      # row (dy) shift: exact flat roll by dy*width
            for xv in variants:
                xs = xv if dy == 0 else shift_flat(xv, dy * width)
                acc = acc + jnp.dot(taps[t], xs, preferred_element_type=jnp.float32)
                t += 1
        return acc + bias_col

    def group_norm(v, gamma, beta):
        # nn.GroupNorm(2, C): biased variance, eps=1e-5.  One lane-sum and one
        # lane-sum-of-squares; group stats derived from the tiny (C,1) vectors.
        c = v.shape[0]
        gs = c // NUM_GROUPS
        n = float(gs * hw)
        s1 = jnp.sum(v, axis=1, keepdims=True)       # (C, 1)
        s2 = jnp.sum(v * v, axis=1, keepdims=True)   # (C, 1)
        ch = lax.broadcasted_iota(jnp.int32, (c, 1), 0)
        mean = jnp.zeros((c, 1), jnp.float32)
        var = jnp.zeros((c, 1), jnp.float32)
        for g in range(NUM_GROUPS):
            m = ((ch // gs) == g).astype(jnp.float32)
            mu = jnp.sum(s1 * m, axis=(0, 1), keepdims=True) / n     # (1, 1)
            ex2 = jnp.sum(s2 * m, axis=(0, 1), keepdims=True) / n
            mean = mean + m * mu
            var = var + m * (ex2 - mu * mu)
        inv = lax.rsqrt(var + EPS)
        return (v - mean) * (inv * gamma) + beta

    x = x_ref[0]                                   # (C_IN, hw)

    # input_conv -> input_norm -> GELU
    x = conv3x3(x, [w_in_ref[t] for t in range(KTAPS)], vcol(0))
    x = group_norm(x, vcol(1), vcol(2))
    x = _gelu(x)

    # two pre-norm residual blocks: id + alpha * conv(silu(gn(conv(silu(gn(x))))))
    def res_block(xin, widx, vbase, alpha):
        out = group_norm(xin, vcol(vbase + 0), vcol(vbase + 1))
        out = _silu(out)
        out = conv3x3(out, [w_rb_ref[widx, t] for t in range(KTAPS)], vcol(vbase + 2))
        out = group_norm(out, vcol(vbase + 3), vcol(vbase + 4))
        out = _silu(out)
        out = conv3x3(out, [w_rb_ref[widx + 1, t] for t in range(KTAPS)], vcol(vbase + 5))
        return xin + alpha * out

    x = res_block(x, 0, 3, alphas_ref[0, 0])
    x = res_block(x, 2, 9, alphas_ref[0, 1])

    # channel attention (14 -> 3 -> 14): tiny, kept off the MXU (pure VPU/XLU).
    pooled = jnp.mean(x, axis=1, keepdims=True)                                # (C_HID, 1)
    h = jnp.sum(ca_w1t_ref[...] * pooled, axis=0, keepdims=True) + ca_b1_ref[...]  # (1, C_MID)
    h = jnp.maximum(h, 0.0)
    att = jax.nn.sigmoid(
        jnp.sum(ca_w2_ref[...] * h, axis=1, keepdims=True) + vcol(15))         # (C_HID, 1)
    x = x * att

    # output 1x1 conv; lane-dense (C_OUT, hw) store.
    y = jnp.dot(w_out_ref[...], x, preferred_element_type=jnp.float32) + b_out_ref[...]
    o_ref[0] = y


# -------- params --------
def init_params(key):
    ks = jax.random.split(key, 8)

    def xavier(k, shape, fan_in, fan_out, gain=0.8):
        std = gain * math.sqrt(2.0 / (fan_in + fan_out))
        return std * jax.random.normal(k, shape, jnp.float32)

    # conv weights stored channels-first per tap: (tap, C_out, C_in)
    w_in = xavier(ks[0], (KTAPS, C_HID, C_IN), C_IN * KTAPS, C_HID * KTAPS)
    w_rb = jnp.stack([
        xavier(ks[1 + i], (KTAPS, C_HID, C_HID), C_HID * KTAPS, C_HID * KTAPS)
        for i in range(4)
    ])                                                    # (4, 9, C_HID, C_HID)
    ca_w1t = xavier(ks[5], (C_HID, C_MID), C_HID, C_MID)  # W1^T  (in, mid)
    ca_w2 = xavier(ks[6], (C_HID, C_MID), C_MID, C_HID)   # W2    (out, mid)
    ca_b1 = jnp.zeros((1, C_MID), jnp.float32)
    w_out = 0.01 * jax.random.normal(ks[7], (C_OUT, C_HID), jnp.float32)
    b_out = jnp.zeros((C_OUT, 1), jnp.float32)

    # per-channel parameter columns (16, C_HID, 1):
    #  0 input_conv.bias | 1 input_norm.gamma | 2 input_norm.beta
    #  3 rb1.norm1.g 4 rb1.norm1.b 5 rb1.conv1.bias 6 rb1.norm2.g 7 rb1.norm2.b 8 rb1.conv2.bias
    #  9..14 same layout for rb2 | 15 channel_attention second 1x1 conv bias
    vecs = np.zeros((16, C_HID, 1), np.float32)
    for r in (1, 3, 6, 9, 12):                            # GroupNorm gammas = 1
        vecs[r] = 1.0
    vecs = jnp.asarray(vecs)

    alphas = jnp.array([[0.3, 0.3]], jnp.float32)         # res-block alphas
    output_scale = jnp.float32(0.1)
    return dict(w_in=w_in, w_rb=w_rb, vecs=vecs, ca_w1t=ca_w1t, ca_b1=ca_b1,
                ca_w2=ca_w2, w_out=w_out, b_out=b_out, alphas=alphas,
                output_scale=output_scale)


# -------- wrapper --------
def local_res_attn_net(plaq_features, rect_features, params):
    """Forward pass.  plaq_features: (B,2,H,W), rect_features: (B,4,H,W) (NCHW,
    matching PyTorch); returns (plaq_coeffs (B,4,H,W), rect_coeffs (B,8,H,W))."""
    b, _, h, w = plaq_features.shape
    hw = h * w
    x = jnp.concatenate([plaq_features, rect_features], axis=1)      # (B,6,H,W)
    # NCHW flattened over space already is the channels-first (B, C, HW) layout
    # the kernel wants: no transposes on either side.
    x = x.reshape(b, C_IN, hw).astype(jnp.float32)

    # W-boundary wrap masks for the flattened circular shifts (tiny constants).
    col = np.arange(hw, dtype=np.int64) % w
    wrap_lo = jnp.asarray((col == 0).astype(np.float32)[None, :])       # (1, hw)
    wrap_hi = jnp.asarray((col == w - 1).astype(np.float32)[None, :])   # (1, hw)

    kernel = functools.partial(_localresattn_kernel, width=w,
                               roll_sign=_roll_sign())

    out = pl.pallas_call(
        kernel,
        out_shape=jax.ShapeDtypeStruct((b, C_OUT, hw), jnp.float32),
        grid=(b,),
        in_specs=[
            pl.BlockSpec((1, C_IN, hw), lambda i: (i, 0, 0)),                # x
            pl.BlockSpec((1, hw), lambda i: (0, 0)),                         # wrap_lo
            pl.BlockSpec((1, hw), lambda i: (0, 0)),                         # wrap_hi
            pl.BlockSpec((KTAPS, C_HID, C_IN), lambda i: (0, 0, 0)),         # w_in
            pl.BlockSpec((4, KTAPS, C_HID, C_HID), lambda i: (0, 0, 0, 0)),  # w_rb
            pl.BlockSpec((16, C_HID, 1), lambda i: (0, 0, 0)),               # vecs
            pl.BlockSpec((C_HID, C_MID), lambda i: (0, 0)),                  # ca_w1t
            pl.BlockSpec((1, C_MID), lambda i: (0, 0)),                      # ca_b1
            pl.BlockSpec((C_HID, C_MID), lambda i: (0, 0)),                  # ca_w2
            pl.BlockSpec((C_OUT, C_HID), lambda i: (0, 0)),                  # w_out
            pl.BlockSpec((C_OUT, 1), lambda i: (0, 0)),                      # b_out
            pl.BlockSpec(memory_space=pltpu.MemorySpace.SMEM),               # alphas (1,2)
        ],
        out_specs=pl.BlockSpec((1, C_OUT, hw), lambda i: (i, 0, 0)),
        # batch elements are independent -> lets v7x shard the grid over both
        # TensorCores; harmless on single-TC v5e/v6e.
        compiler_params=pltpu.CompilerParams(dimension_semantics=("parallel",)),
    )(x, wrap_lo, wrap_hi, params["w_in"], params["w_rb"], params["vecs"],
      params["ca_w1t"], params["ca_b1"], params["ca_w2"],
      params["w_out"], params["b_out"], params["alphas"])

    # TODO(synk): lax.atan has no Mosaic TPU lowering; the final elementwise
    # arctan / pi / 2 * output_scale and the channel split stay in plain JAX.
    y = out.reshape(b, C_OUT, h, w)
    y = jnp.arctan(y) / math.pi / 2.0
    y = params["output_scale"] * y
    return y[:, :C_PLAQ_OUT], y[:, C_PLAQ_OUT:]


# -------- pure-JAX (XLA) reference of the same forward pass, for self-checking --------
def _reference_forward(plaq_features, rect_features, params):
    hi = lax.Precision.HIGHEST
    x = jnp.concatenate([plaq_features, rect_features], axis=1).astype(jnp.float32)
    v = params["vecs"][:, :, 0]                                        # (16, C_HID)

    def conv3x3(xx, w_taps, bias):
        out = jnp.zeros((xx.shape[0], w_taps.shape[1]) + xx.shape[2:], jnp.float32)
        t = 0
        for dy in (-1, 0, 1):
            for dx in (-1, 0, 1):
                xs = jnp.roll(xx, shift=(-dy, -dx), axis=(2, 3))
                out = out + jnp.einsum('oc,bchw->bohw', w_taps[t], xs, precision=hi)
                t += 1
        return out + bias.reshape(1, -1, 1, 1)

    def gn(xx, gamma, beta):
        b, c, h, w = xx.shape
        xg = xx.reshape(b, NUM_GROUPS, c // NUM_GROUPS, h, w)
        mu = xg.mean(axis=(2, 3, 4), keepdims=True)
        var = ((xg - mu) ** 2).mean(axis=(2, 3, 4), keepdims=True)
        xg = (xg - mu) / jnp.sqrt(var + EPS)
        return xg.reshape(b, c, h, w) * gamma.reshape(1, c, 1, 1) + beta.reshape(1, c, 1, 1)

    x = conv3x3(x, params["w_in"], v[0])
    x = gn(x, v[1], v[2])
    x = jax.nn.gelu(x, approximate=False)

    def rb(xx, widx, vbase, alpha):
        out = jax.nn.silu(gn(xx, v[vbase], v[vbase + 1]))
        out = conv3x3(out, params["w_rb"][widx], v[vbase + 2])
        out = jax.nn.silu(gn(out, v[vbase + 3], v[vbase + 4]))
        out = conv3x3(out, params["w_rb"][widx + 1], v[vbase + 5])
        return xx + alpha * out

    x = rb(x, 0, 3, params["alphas"][0, 0])
    x = rb(x, 2, 9, params["alphas"][0, 1])

    pooled = x.mean(axis=(2, 3))                                       # (B, C_HID)
    h = jax.nn.relu(jnp.einsum('bc,cm->bm', pooled, params["ca_w1t"], precision=hi)
                    + params["ca_b1"])
    att = jax.nn.sigmoid(jnp.einsum('bm,cm->bc', h, params["ca_w2"], precision=hi) + v[15])
    x = x * att[:, :, None, None]

    y = jnp.einsum('oc,bchw->bohw', params["w_out"], x, precision=hi)
    y = y + params["b_out"].reshape(1, -1, 1, 1)
    y = jnp.arctan(y) / math.pi / 2.0
    y = params["output_scale"] * y
    return y[:, :C_PLAQ_OUT], y[:, C_PLAQ_OUT:]


if __name__ == "__main__":
    key = jax.random.PRNGKey(0)
    k_plaq, k_rect, k_params = jax.random.split(key, 3)
    B, H, W = 2, 16, 16
    plaq = jax.random.normal(k_plaq, (B, C_PLAQ_IN, H, W), jnp.float32)
    rect = jax.random.normal(k_rect, (B, C_RECT_IN, H, W), jnp.float32)
    params = init_params(k_params)

    plaq_coeffs, rect_coeffs = local_res_attn_net(plaq, rect, params)
    (plaq_coeffs, rect_coeffs) = jax.block_until_ready((plaq_coeffs, rect_coeffs))

    assert plaq_coeffs.shape == (B, C_PLAQ_OUT, H, W)
    assert rect_coeffs.shape == (B, C_RECT_OUT, H, W)
    assert bool(jnp.all(jnp.isfinite(plaq_coeffs)))
    assert bool(jnp.all(jnp.isfinite(rect_coeffs)))

    # end-to-end self-check against the pure-JAX reference
    ref_plaq, ref_rect = _reference_forward(plaq, rect, params)
    np.testing.assert_allclose(np.asarray(plaq_coeffs), np.asarray(ref_plaq),
                               rtol=1e-3, atol=5e-5)
    np.testing.assert_allclose(np.asarray(rect_coeffs), np.asarray(ref_rect),
                               rtol=1e-3, atol=5e-5)
    print("KERNEL_OK")
</pallas_src>

<mosaic_0001>
module attributes {stable_mosaic.version = 11 : i64} {
  func.func @probe(%arg0: memref<8x128xf32, #tpu.memory_space<vmem>>, %arg1: memref<8x128xf32, #tpu.memory_space<vmem>>) attributes {dimension_semantics = [], scalar_prefetch = 0 : i64, scratch_operands = 0 : i64, tpu.core_type = #tpu.core_type<tc>} {
    %c0 = arith.constant 0 : index
    %c0_0 = arith.constant 0 : index
    %0 = vector.load %arg0[%c0, %c0_0] : memref<8x128xf32, #tpu.memory_space<vmem>>, vector<8x128xf32>
    %c1_i32 = arith.constant 1 : i32
    %1 = tpu.dynamic_rotate %0 by %c1_i32 dim 1 : vector<8x128xf32>, i32 -> vector<8x128xf32>
    %c0_1 = arith.constant 0 : index
    %c0_2 = arith.constant 0 : index
    %2 = vector.load %arg1[%c0_1, %c0_2] : memref<8x128xf32, #tpu.memory_space<vmem>>, vector<8x128xf32>
    tpu.vector_store %arg1[%c0_1, %c0_2], %1 {strides = array<i32>} : memref<8x128xf32, #tpu.memory_space<vmem>>, vector<8x128xf32>,
    return
  }
}

</mosaic_0001>

<bundles_post_ra>
// kernel: tpu_custom_call.1
= control target key start
LH: loop header
LB: loop body
LE: loop exit
PB: predicated region body
PF: predicated region fallthrough
CT: control target
= control target key end

     0   :  { %6 = vsyncpa [#allocation3], 0  ;;  %s128_s0 = inlined_call_operand.hbm [shape: f32[8,128], index: 0, kind: input, shape index: {}]   ;;  %s129_s1 = inlined_call_operand.hbm [shape: f32[8,128], index: 1, kind: output, shape index: {}]  }
   0x1   :  { %7 = vsyncpa [#allocation4], 0  ;;  %s91_s6 = smov [#allocation2]   ;;  %s43_s10 = scalar_lea.hbm %s128_s0, 128 }
   0x2   :  { %s14_s7 = sshll.u32 %s91_s6, 4  ;;  %p44_p0 = scmp.ne.s32.totalorder %s128_s0, %s43_s10  ;;  %s15_s7 = int_to_ptr.vmem [resolvable:$true] %s14_s7 }
   0x3   :  { %p47_p1 = scmp.lt.u32.totalorder %s43_s10, %s128_s0 }
   0x5   :  { %p49_p2 = pnand %p47_p1, %p44_p0 }
   0x7   :  { %52 = shalt.err (!%p49_p2)
}
   0x8   :  { %s53_s15 = scalar_lea.vmem %s15_s7, 128  ;;  %p58_p4 = scmp.lt.s32.totalorder %s15_s7, %s15_s7 }
   0x9   :  { %p54_p3 = scmp.ne.s32.totalorder %s15_s7, %s53_s15  ;;  %p59_p5 = scmp.lt.s32.totalorder %s53_s15, %s53_s15 }
   0xb   :  { %p60_p6 = por %p59_p5, %p58_p4 }
   0xd   :  { %p61_p7 = pnand %p60_p6, %p54_p3 }
   0xf   :  { %64 = shalt.err (!%p61_p7)
}
  0x10   :  { %17 = dma.hbm_to_vmem [thread:$0]  %s128_s0, 128, %s15_s7, [#allocation3]  }
  0x11   :  { %87 = dma.done.wait [#allocation3], 128  }
  0x12   :  { %88 = vsyncadd [#allocation3], 4294967168  ;;  %v21_v0 = vld [vmem:[#allocation2] sm:$0xff]  ;;  %s92_s18 = smov 1   ;;  %s93_s19 = smov [#allocation5]  }
  0x13   :  { %22 = vrot.lane.b32.xlu0 %v21_v0, %s92_s18  ;;  %s31_s20 = sshll.u32 %s93_s19, 4  ;;  %s32_s20 = int_to_ptr.vmem [resolvable:$true] %s31_s20 }
  0x14   :  { %s65_s21 = scalar_lea.vmem %s32_s20, 128  ;;  %p70_p9 = scmp.lt.s32.totalorder %s32_s20, %s32_s20 }
  0x15   :  { %p66_p8 = scmp.ne.s32.totalorder %s32_s20, %s65_s21  ;;  %p71_p10 = scmp.lt.s32.totalorder %s65_s21, %s65_s21 }
  0x17   :  { %p72_p11 = por %p71_p10, %p70_p9 }
  0x19   :  { %p73_p12 = pnand %p72_p11, %p66_p8 }
  0x85   :  { %v23_v1 = vpop.permute.xlu0 %22 }
  0x86   :  { %24 = vst [vmem:[#allocation5] sm:$0xff] %v23_v1 }
  0x87   :  { %76 = shalt.err (!%p73_p12)
}
  0x88   :  { %s77_s0 = scalar_lea.hbm %s129_s1, 128 }
  0x89   :  { %p78_p13 = scmp.ne.s32.totalorder %s129_s1, %s77_s0  ;;  %p81_p0 = scmp.lt.u32.totalorder %s77_s0, %s129_s1 }
  0x8b   :  { %p83_p1 = pnand %p81_p0, %p78_p13 }
  0x8d   :  { %86 = shalt.err (!%p83_p1)
}
  0x8e   :  { %34 = dma.vmem_to_hbm [thread:$0]  %s32_s20, 128, %s129_s1, [#allocation4]  }
  0x8f   :  { %89 = dma.done.wait [#allocation4], 128  }
  0x90   :  { %90 = vsyncadd [#allocation4], 4294967168 }
  0x91   :  { %38 = vsyncpa [#allocation3], 1 }
  0x92   :  { %39 = vsyncpa [#allocation4], 1 }

</bundles_post_ra>
